<compile_context>
chip_gen: v5e
topology: v5e:2x2
jax: 0.10.0
libtpu: 0.0.40
codegen_flags: <defaults>
</compile_context>

<pallas_src>
import jax
import jax.numpy as jnp
from jax import lax
from jax.experimental import pallas as pl
from jax.experimental.pallas import tpu as pltpu


def _round_up(x, m):
    return ((x + m - 1) // m) * m


def _pick_tile(padded_dim, base, max_tile):
    """Largest multiple of `base` <= max_tile that divides padded_dim (a multiple of base)."""
    t = min((max_tile // base) * base, padded_dim)
    while t > base:
        if padded_dim % t == 0:
            return t
        t -= base
    return base


def head_kernel(x_ref, w_ref, b_ref, o_ref):
    # x_ref: (tb, Kb)  activation tile (zero-padded columns beyond subset_dim)
    # w_ref: (tc, Kb)  class-tile window of the ORIGINAL weight (PyTorch (C, E) layout)
    # b_ref: (1, tc)   bias tile (f32)
    # o_ref: (tb, tc)  lane-dense output tile
    acc = lax.dot_general(
        x_ref[...], w_ref[...],
        dimension_numbers=(((1,), (1,)), ((), ())),   # contract the feature axes
        preferred_element_type=jnp.float32,
    )
    o_ref[...] = (acc + b_ref[...].astype(jnp.float32)).astype(o_ref.dtype)


def modified_head_forward(x, weight, bias, subset_dim, *,
                          batch_tile=512, class_tile=512,
                          compute_dtype=jnp.bfloat16, out_dtype=jnp.float32):
    """Pallas implementation of ModifiedHead.forward after configure_subnetwork()."""
    assert x.ndim == 2 and x.shape[-1] == subset_dim, \
        "input feature dim must equal the configured subset dim"
    B, _ = x.shape
    C, E = weight.shape
    assert 0 < subset_dim <= E

    # ---- dtypes (casts are skipped when the caller already stores these dtypes) ----
    x_c = x if x.dtype == compute_dtype else x.astype(compute_dtype)
    w_c = weight if weight.dtype == compute_dtype else weight.astype(compute_dtype)
    b_f32 = bias if bias.dtype == jnp.float32 else bias.astype(jnp.float32)

    # ---- contraction (K) axis: window the ORIGINAL weight in-kernel (no copy) ----
    k_pad = _round_up(subset_dim, 128)
    k_blk = k_pad if k_pad <= E else E         # 128-multiple, or the full E dim

    # ---- batch (B) axis: minimal padding, largest dividing tile ----
    b_pad = _round_up(B, 8)
    tb = _pick_tile(b_pad, 8, batch_tile)
    gb = b_pad // tb

    # ---- class (C) axis ----
    if C <= class_tile:
        tc, c_out = C, C                       # single full-dim class block: no pad/copy
    else:
        c_out = _round_up(C, 128)
        tc = _pick_tile(c_out, 128, class_tile)
        # If tc does not divide C the last weight class-block is a partial boundary
        # block; its out-of-bounds rows are unspecified but only feed output columns
        # >= C which are sliced off below.
    gc = c_out // tc

    # ---- tiny host-side preps (never touch the big weight) ----
    if (b_pad, k_blk) != x_c.shape:
        x_p = jnp.pad(x_c, ((0, b_pad - B), (0, k_blk - subset_dim)))
    else:
        x_p = x_c
    b2 = (jnp.pad(b_f32, (0, c_out - C)) if c_out != C else b_f32).reshape(1, c_out)

    # ---- explicit VMEM budget from actual tile sizes ----
    c_item = jnp.dtype(compute_dtype).itemsize
    o_item = jnp.dtype(out_dtype).itemsize
    vmem_needed = 2 * (tb * k_blk * c_item + tc * k_blk * c_item
                       + tb * tc * o_item + tc * 4)
    try:
        vmem_cap = int(pltpu.get_tpu_info().vmem_capacity_bytes)
    except Exception:
        vmem_cap = 64 * 1024 * 1024            # v7x per-core floor
    vmem_limit = int(min(vmem_cap - (2 << 20),
                         max(2 * vmem_needed + (4 << 20), 32 << 20)))

    flops = 2 * b_pad * k_blk * c_out
    bytes_accessed = (C * k_blk * c_item               # weight: streamed exactly once
                      + gc * b_pad * k_blk * c_item    # x: re-read once per class tile
                      + c_out * 4                      # bias
                      + b_pad * c_out * o_item)        # output write

    # Megacore: split the class axis (disjoint weight halves per core) when possible.
    dim_sem = ("parallel", "arbitrary") if gc > 1 else ("arbitrary", "parallel")

    out = pl.pallas_call(
        head_kernel,
        out_shape=jax.ShapeDtypeStruct((b_pad, c_out), out_dtype),
        grid_spec=pltpu.PrefetchScalarGridSpec(
            num_scalar_prefetch=0,
            grid=(gc, gb),                               # class outer, batch inner
            in_specs=[
                pl.BlockSpec((tb, k_blk), lambda j, i: (i, 0)),   # x rows tile
                pl.BlockSpec((tc, k_blk), lambda j, i: (j, 0)),   # weight window (no copy)
                pl.BlockSpec((1, tc),     lambda j, i: (0, j)),   # bias tile
            ],
            out_specs=pl.BlockSpec((tb, tc), lambda j, i: (i, j)),
        ),
        compiler_params=pltpu.CompilerParams(
            dimension_semantics=dim_sem,
            vmem_limit_bytes=vmem_limit,
        ),
        cost_estimate=pl.CostEstimate(
            flops=flops, transcendentals=0, bytes_accessed=bytes_accessed),
    )(x_p, w_c, b2)

    if b_pad != B or c_out != C:
        out = out[:B, :C]
    return out


if __name__ == "__main__":
    # Shapes consistent with the module defaults: embed_dim=192, num_classes=100,
    # scale_factors [1/4, 1/2, 1]  ->  configure_subnetwork(192 // 4) == 48.
    embed_dim = 192
    num_classes = 100
    subset_dim = embed_dim // 4
    batch = 16

    key = jax.random.PRNGKey(0)
    kx, kw, kb = jax.random.split(key, 3)
    x = jax.random.normal(kx, (batch, subset_dim), dtype=jnp.float32)
    weight = jax.random.normal(kw, (num_classes, embed_dim), dtype=jnp.float32) * 0.02
    bias = jax.random.normal(kb, (num_classes,), dtype=jnp.float32) * 0.02

    # Pure-JAX reference (same semantics as F.linear on the sliced weight).
    ref = lax.dot_general(
        x, weight[:, :subset_dim],
        dimension_numbers=(((1,), (1,)), ((), ())),
        precision=lax.Precision.HIGHEST,
    ) + bias[None, :]

    # f32-compute path: exact semantics of the original module.
    out_f32 = jax.block_until_ready(
        modified_head_forward(x, weight, bias, subset_dim, compute_dtype=jnp.float32))
    assert out_f32.shape == (batch, num_classes)
    assert out_f32.dtype == jnp.float32
    assert jnp.allclose(out_f32, ref, rtol=2e-3, atol=2e-3), "f32 path mismatch vs reference"

    # Default bf16-compute path (performance configuration; f32 accumulation).
    out_bf16 = jax.block_until_ready(modified_head_forward(x, weight, bias, subset_dim))
    assert out_bf16.shape == (batch, num_classes)
    assert jnp.allclose(out_bf16, ref, rtol=5e-2, atol=1e-2), "bf16 path mismatch vs reference"

    print("KERNEL_OK")
</pallas_src>

<mosaic_0001>
module attributes {stable_mosaic.version = 11 : i64} {
  func.func @head_kernel(%arg0: i32, %arg1: i32, %arg2: memref<16x128xf32, #tpu.memory_space<vmem>>, %arg3: memref<100x128xf32, #tpu.memory_space<vmem>>, %arg4: memref<1x100xf32, #tpu.memory_space<vmem>>, %arg5: memref<16x100xf32, #tpu.memory_space<vmem>>) attributes {dimension_semantics = [#tpu.dimension_semantics<arbitrary>, #tpu.dimension_semantics<parallel>], iteration_bounds = array<i64: 1, 1>, scalar_prefetch = 0 : i64, scratch_operands = 0 : i64, tpu.core_type = #tpu.core_type<tc>, window_params = [{transform_indices = @transform_0, window_bounds = array<i64: 16, 128>}, {transform_indices = @transform_1, window_bounds = array<i64: 100, 128>}, {transform_indices = @transform_2, window_bounds = array<i64: 1, 100>}, {transform_indices = @transform_3, window_bounds = array<i64: 16, 100>}]} {
    %c0 = arith.constant 0 : index
    %c0_0 = arith.constant 0 : index
    %0 = vector.load %arg2[%c0, %c0_0] : memref<16x128xf32, #tpu.memory_space<vmem>>, vector<16x128xf32>
    %c0_1 = arith.constant 0 : index
    %c0_2 = arith.constant 0 : index
    %1 = vector.load %arg3[%c0_1, %c0_2] : memref<100x128xf32, #tpu.memory_space<vmem>>, vector<100x128xf32>
    %cst = arith.constant dense<0.000000e+00> : vector<16x100xf32>
    %2 = tpu.matmul %0, %1, %cst {dimension_numbers = #tpu.dot_dimension_numbers<[1], [1], [0], [0], [0, 0, 1, 0], [], []>} : vector<16x128xf32>, vector<100x128xf32>, vector<16x100xf32> -> vector<16x100xf32>
    %c0_3 = arith.constant 0 : index
    %c0_4 = arith.constant 0 : index
    %3 = vector.load %arg4[%c0_3, %c0_4] : memref<1x100xf32, #tpu.memory_space<vmem>>, vector<1x100xf32>
    %4 = vector.broadcast %3 : vector<1x100xf32> to vector<16x100xf32>
    %5 = arith.addf %2, %4 : vector<16x100xf32>
    %c0_5 = arith.constant 0 : index
    %c0_6 = arith.constant 0 : index
    %6 = vector.load %arg5[%c0_5, %c0_6] : memref<16x100xf32, #tpu.memory_space<vmem>>, vector<16x100xf32>
    tpu.vector_store %arg5[%c0_5, %c0_6], %5 {strides = array<i32>} : memref<16x100xf32, #tpu.memory_space<vmem>>, vector<16x100xf32>,
    return
  }
  func.func @transform_0(%arg0: i32, %arg1: i32) -> (i32, i32) {
    %c0_i32 = arith.constant 0 : i32
    %c0_i32_0 = arith.constant 0 : i32
    return %arg1, %c0_i32 : i32, i32
  }
  func.func @transform_1(%arg0: i32, %arg1: i32) -> (i32, i32) {
    %c0_i32 = arith.constant 0 : i32
    %c0_i32_0 = arith.constant 0 : i32
    return %arg0, %c0_i32 : i32, i32
  }
  func.func @transform_2(%arg0: i32, %arg1: i32) -> (i32, i32) {
    %c0_i32 = arith.constant 0 : i32
    %c0_i32_0 = arith.constant 0 : i32
    return %c0_i32, %arg0 : i32, i32
  }
  func.func @transform_3(%arg0: i32, %arg1: i32) -> (i32, i32) {
    %c0_i32 = arith.constant 0 : i32
    return %arg1, %arg0 : i32, i32
  }
}

</mosaic_0001>

<bundles_post_ra>
// kernel: tpu_custom_call.1
= control target key start
LH: loop header
LB: loop body
LE: loop exit
PB: predicated region body
PF: predicated region fallthrough
CT: control target
= control target key end

     0   :  { %s282_s0 = inlined_call_operand.vmem [shape: f32[16,128], index: 0, kind: input, shape index: {}]   ;;  %s283_s1 = inlined_call_operand.vmem [shape: f32[100,192], index: 1, kind: input, shape index: {}]   ;;  %s284_s2 = inlined_call_operand.vmem [shape: f32[1,100], index: 2, kind: input, shape index: {}]   ;;  %s285_s3 = inlined_call_operand.hbm [shape: f32[16,100], index: 3, kind: output, shape index: {}]  }
   0x1   :  { %v89_v0 = vld [vmem:[%s283_s1 + $0xc0] sm:$0xff]  ;;  %v87_v1 = vld [vmem:[%s283_s1 + $0xb0] sm:$0xff] }
   0x2   :  { %90 = vst [vmem:[#allocation2 + $0x40] sm:$0xff] %v89_v0  ;;  %v85_v2 = vld [vmem:[%s283_s1 + $0xa0] sm:$0xff]  ;;  %v83_v3 = vld [vmem:[%s283_s1 + $0x90] sm:$0xff] }
   0x3   :  { %8 = vsyncpa [#allocation4], 0  ;;  %v81_v4 = vld [vmem:[%s283_s1 + $0x80] sm:$0xff]  ;;  %v79_v5 = vld [vmem:[%s283_s1 + $0x70] sm:$0xff]  ;;  %s208_s16 = smov [#allocation3]   ;;  %s149_s20 = sshll.u32 %s285_s3, 4  ;;  %s150_s20 = int_to_ptr.hbm [resolvable:$true] %s149_s20 }
   0x4   :  { %v77_v6 = vld [vmem:[%s283_s1 + $0x60] sm:$0xff]  ;;  %v75_v7 = vld [vmem:[%s283_s1 + $0x50] sm:$0xff]  ;;  %v99_v15 = vld [vmem:[%s282_s0 + $0x8] sm:$0xff]  ;;  %s147_s17 = sshll.u32 %s208_s16, 4  ;;  %vm140_vm0 = vcmask 818176   ;;  %s210_s21 = smov 8   ;;  %s148_s17 = int_to_ptr.vmem [resolvable:$true] %s147_s17 }
   0x5   :  { %v73_v9 = vld [vmem:[%s283_s1 + $0x40] sm:$0xff]  ;;  %v71_v10 = vld [vmem:[%s283_s1 + $0x30] sm:$0xff] }
   0x6   :  { %v69_v11 = vld [vmem:[%s283_s1 + $0x20] sm:$0xff]  ;;  %v67_v12 = vld [vmem:[%s283_s1 + $0x10] sm:$0xff] }
   0x7   :  { %v65_v13 = vld [vmem:[%s283_s1] sm:$0xff] }
   0x8   :  { %v98_v14 = vld [vmem:[%s282_s0] sm:$0xff]  ;;  %s209_s0 = smov 128  }
   0x9   :  { %v112_v8 = vld [vmem:[#allocation2 + $0x40] sm:$0xf] }
   0xa   :  { %120 = vmatpush.xpose.msra.mxu0 %v112_v8  ;;  %165 = vmatpush.xpose.msra.mxu1 %v112_v8  ;;  %v181_v16 = vld [vmem:[%s284_s2] ss:$0 sm:$0xff] }
   0xe   :  { %121 = vmatpush.xpose.msra.mxu0 %v87_v1  ;;  %166 = vmatpush.xpose.msra.mxu1 %v87_v1 }
  0x12   :  { %122 = vmatpush.xpose.msra.mxu0 %v85_v2  ;;  %167 = vmatpush.xpose.msra.mxu1 %v85_v2 }
  0x16   :  { %123 = vmatpush.xpose.msra.mxu0 %v83_v3  ;;  %168 = vmatpush.xpose.msra.mxu1 %v83_v3 }
  0x1a   :  { %124 = vmatpush.xpose.msra.mxu0 %v81_v4  ;;  %169 = vmatpush.xpose.msra.mxu1 %v81_v4 }
  0x1e   :  { %125 = vmatpush.xpose.msra.mxu0 %v79_v5  ;;  %170 = vmatpush.xpose.msra.mxu1 %v79_v5 }
  0x22   :  { %126 = vmatpush.xpose.msra.mxu0 %v77_v6  ;;  %171 = vmatpush.xpose.msra.mxu1 %v77_v6 }
  0x26   :  { %127 = vmatpush.xpose.msra.mxu0 %v75_v7  ;;  %172 = vmatpush.xpose.msra.mxu1 %v75_v7 }
  0x2a   :  { %128 = vmatpush.xpose.msra.mxu0 %v73_v9  ;;  %173 = vmatpush.xpose.msra.mxu1 %v73_v9 }
  0x2e   :  { %129 = vmatpush.xpose.msra.mxu0 %v71_v10  ;;  %174 = vmatpush.xpose.msra.mxu1 %v71_v10 }
  0x32   :  { %130 = vmatpush.xpose.msra.mxu0 %v69_v11  ;;  %175 = vmatpush.xpose.msra.mxu1 %v69_v11 }
  0x36   :  { %131 = vmatpush.xpose.msra.mxu0 %v67_v12  ;;  %176 = vmatpush.xpose.msra.mxu1 %v67_v12 }
  0x3a   :  { %132 = vmatpush.xpose.msra.mxu0 %v65_v13  ;;  %177 = vmatpush.xpose.msra.mxu1 %v65_v13 }
  0x3d   :  { %133 = vmatmul.f32.vlgmr.msra.gmra.mxu0 %v98_v14  ;;  %136 = vmatmul.f32.vlgmr.msra.gmra.mxu1 %v99_v15 }
  0xba   :  { %v134_v17 = vpop.f32.mrf.mxu0  ;;  %v137_v18 = vpop.f32.mrf.mxu1 }
  0xbb   :  { %v135_v19 = vadd.f32 %v181_v16, %v134_v17  ;;  %v138_v20 = vadd.f32 %v181_v16, %v137_v18 }
  0xbd   :  { %141 = vst.msk [vmem:[#allocation3] sm:$0xff] %vm140_vm0, %v135_v19 }
  0xbe   :  { %142 = vst.msk [vmem:[#allocation3 + $0x8] sm:$0xff] %vm140_vm0, %v138_v20 }
  0xbf   :  { %155 = dma.vmem_to_hbm [thread:$0]  %s148_s17, 256, %s150_s20, [#allocation4], %s209_s0, %s209_s0, %s210_s21  }
  0xc0   :  { %206 = dma.done.wait [#allocation4], 256  }
  0xc1   :  { %207 = vsyncadd [#allocation4], 4294967040 }
  0xc2   :  { %160 = vsyncpa [#allocation4], 1 }

</bundles_post_ra>
